<compile_context>
chip_gen: v5e
topology: v5e:2x2
jax: 0.10.0
libtpu: 0.0.40
codegen_flags: <defaults>
</compile_context>

<pallas_src>
import functools

import jax
import jax.numpy as jnp
from jax.experimental import pallas as pl
from jax.experimental.pallas import tpu as pltpu

EPS = 1e-8


def _round_up(x, m):
    return (x + m - 1) // m * m


def _dist_kernel(zs_ref, zt_ref, out_ref, inter_ref, moments, *,
                 beta, gamma, tau, B, C, TB, mask_rows):
    i = pl.program_id(0)
    last = pl.num_programs(0) - 1

    @pl.when(i == 0)
    def _init():
        inter_ref[0] = 0.0
        moments[...] = jnp.zeros_like(moments)

    zs = zs_ref[...].astype(jnp.float32)
    zt = zt_ref[...].astype(jnp.float32)

    ones_col = jnp.ones((C, 1), dtype=jnp.float32)
    inv_tau = jnp.float32(1.0 / tau)

    def softmax_rows(x):
        m = jnp.max(x, axis=1, keepdims=True)                  # lane max (XLU)
        arg = x - m
        if tau != 1.0:                                          # trace-time elision
            arg = arg * inv_tau                                 # fold 1/tau into exp arg
        e = jnp.exp(arg)                                        # EUP
        # row-sum on the MXU instead of a cross-lane reduction
        denom = jnp.dot(e, ones_col, preferred_element_type=jnp.float32)
        inv = pl.reciprocal(denom, approx=False)                # TB recips, not TB*C divides
        return e * inv

    ys = softmax_rows(zs)
    yt = softmax_rows(zt)

    if mask_rows:
        # Partial last block: rows past B contain garbage from the clipped DMA;
        # the select discards them (NaN in the not-taken branch is fine).
        row_ids = i * TB + jax.lax.broadcasted_iota(jnp.int32, (TB, 1), 0)
        row_valid = row_ids < B
        ys = jnp.where(row_valid, ys, 0.0)
        yt = jnp.where(row_valid, yt, 0.0)

    prod = ys * yt
    ys2 = ys * ys
    yt2 = yt * yt

    # ---- inter-class relation: row-wise Pearson via raw moments on the MXU.
    # softmax rows sum to 1  =>  row mean == 1/C, so
    #   sum((x-1/C)(y-1/C)) = sum(xy) - 1/C,  sum((x-1/C)^2) = sum(x^2) - 1/C.
    sxy = jnp.dot(prod, ones_col, preferred_element_type=jnp.float32)   # (TB,1)
    sxx = jnp.dot(ys2, ones_col, preferred_element_type=jnp.float32)
    syy = jnp.dot(yt2, ones_col, preferred_element_type=jnp.float32)
    inv_c = jnp.float32(1.0 / C)
    num = sxy - inv_c
    an = jnp.sqrt(jnp.maximum(sxx - inv_c, 0.0))
    bn = jnp.sqrt(jnp.maximum(syy - inv_c, 0.0))
    cos_row = num / (an * bn + EPS)
    if mask_rows:
        cos_row = jnp.where(row_valid, cos_row, 0.0)
    # Scalar accumulation in SMEM (no lane-sparse VMEM accumulator).
    inter_ref[0] += jnp.sum(cos_row)

    # ---- intra-class relation: stream per-column raw moments across the grid.
    moments[0:1, :] += jnp.sum(ys, axis=0, keepdims=True)
    moments[1:2, :] += jnp.sum(yt, axis=0, keepdims=True)
    moments[2:3, :] += jnp.sum(prod, axis=0, keepdims=True)
    moments[3:4, :] += jnp.sum(ys2, axis=0, keepdims=True)
    moments[4:5, :] += jnp.sum(yt2, axis=0, keepdims=True)

    @pl.when(i == last)
    def _finalize():
        n = jnp.float32(B)
        sx = moments[0:1, :]
        sy = moments[1:2, :]
        sxy_c = moments[2:3, :]
        sxx_c = moments[3:4, :]
        syy_c = moments[4:5, :]
        cov = sxy_c - sx * sy / n
        vx = jnp.maximum(sxx_c - sx * sx / n, 0.0)
        vy = jnp.maximum(syy_c - sy * sy / n, 0.0)
        cos_col = cov / (jnp.sqrt(vx) * jnp.sqrt(vy) + EPS)
        intra_mean = jnp.sum(cos_col) / jnp.float32(C)
        inter_mean = inter_ref[0] / n
        t2 = jnp.float32(tau * tau)
        out_ref[0] = beta * t2 * (1.0 - inter_mean) + gamma * t2 * (1.0 - intra_mean)


def _vmem_limit_bytes():
    """Generation-aware scoped-VMEM limit (~half of physical VMEM)."""
    try:
        cap = int(pltpu.get_tpu_info().vmem_capacity_bytes)
    except Exception:
        cap = 64 * 1024 * 1024   # safe default (v7x per-core physical VMEM)
    # v5e/v6e (128 MiB) -> 64 MiB; v7x (64 MiB) -> 32 MiB.
    return max(16 * 1024 * 1024, min(cap // 2, 96 * 1024 * 1024))


def dist_loss(z_s, z_t, *, beta=1.0, gamma=1.0, tau=1.0):
    assert z_s.ndim == 2 and z_s.shape == z_t.shape
    B, C = z_s.shape

    vmem_limit = _vmem_limit_bytes()

    # Tile rows so that (2 inputs x 2 pipeline buffers) in the input dtype plus
    # ~8 full-tile f32 temporaries fit in ~half the scoped-VMEM limit.
    c_lane = _round_up(C, 128)                      # physical lane-padded row width
    in_bytes = jnp.dtype(z_s.dtype).itemsize
    per_row_bytes = 4 * c_lane * in_bytes + 8 * c_lane * 4
    budget = vmem_limit // 2
    tb = (budget // per_row_bytes) // 8 * 8
    tb = int(max(8, min(tb, 8192)))
    if B <= 8:
        tb = B                                      # full-extent block (legal even if < 8)
    else:
        tb = min(tb, (B // 8) * 8)                  # multiple of 8, <= B

    grid = pl.cdiv(B, tb)
    mask_rows = (B % tb) != 0                       # trace-time mask elision

    kernel = functools.partial(
        _dist_kernel, beta=float(beta), gamma=float(gamma), tau=float(tau),
        B=B, C=C, TB=tb, mask_rows=mask_rows)

    out = pl.pallas_call(
        kernel,
        out_shape=jax.ShapeDtypeStruct((1,), jnp.float32),
        grid=(grid,),
        in_specs=[
            pl.BlockSpec((tb, C), lambda i: (i, 0)),
            pl.BlockSpec((tb, C), lambda i: (i, 0)),
        ],
        out_specs=pl.BlockSpec(memory_space=pltpu.MemorySpace.SMEM),
        scratch_shapes=[
            pltpu.SMEM((1,), jnp.float32),          # running sum of row cosines
            pltpu.VMEM((8, C), jnp.float32),        # streaming per-column raw moments
        ],
        compiler_params=pltpu.CompilerParams(
            dimension_semantics=("arbitrary",),
            vmem_limit_bytes=int(vmem_limit),
        ),
    )(z_s, z_t)
    return out[0]


def _dist_ref(z_s, z_t, beta=1.0, gamma=1.0, tau=1.0):
    # pure-JAX reference (mirrors the PyTorch module)
    ys = jax.nn.softmax(z_s / tau, axis=1)
    yt = jax.nn.softmax(z_t / tau, axis=1)

    def pearson_mean(a, b, axis):
        ac = a - a.mean(axis=axis, keepdims=True)
        bc = b - b.mean(axis=axis, keepdims=True)
        cos = (ac * bc).sum(axis) / (
            jnp.linalg.norm(ac, axis=axis) * jnp.linalg.norm(bc, axis=axis) + EPS
        )
        return cos.mean()

    inter = 1.0 - pearson_mean(ys, yt, axis=1)
    intra = 1.0 - pearson_mean(ys, yt, axis=0)
    return beta * tau ** 2 * inter + gamma * tau ** 2 * intra


if __name__ == "__main__":
    key = jax.random.PRNGKey(0)
    k1, k2 = jax.random.split(key)
    B, C = 8, 32  # batch of 8 samples, 32 classes
    z_s = jax.random.normal(k1, (B, C), dtype=jnp.float32)
    z_t = jax.random.normal(k2, (B, C), dtype=jnp.float32)

    out = dist_loss(z_s, z_t, beta=1.0, gamma=1.0, tau=1.0)
    out = jax.block_until_ready(out)

    ref = _dist_ref(z_s, z_t)
    assert jnp.allclose(out, ref, atol=1e-4, rtol=1e-4), (out, ref)
    print("KERNEL_OK")
</pallas_src>

<mosaic_0001>
module attributes {stable_mosaic.version = 11 : i64} {
  func.func @_dist_kernel(%arg0: i32, %arg1: memref<8x32xf32, #tpu.memory_space<vmem>>, %arg2: memref<8x32xf32, #tpu.memory_space<vmem>>, %arg3: memref<1xf32, #tpu.memory_space<smem>>, %arg4: memref<1xf32, #tpu.memory_space<smem>>, %arg5: memref<8x32xf32, #tpu.memory_space<vmem>>) attributes {dimension_semantics = [#tpu.dimension_semantics<arbitrary>], iteration_bounds = array<i64: 1>, scalar_prefetch = 0 : i64, scratch_operands = 2 : i64, tpu.core_type = #tpu.core_type<tc>, window_params = [{transform_indices = @transform_0, window_bounds = array<i64: 8, 32>}, {transform_indices = @transform_1, window_bounds = array<i64: 8, 32>}, {transform_indices = @transform_2, window_bounds = array<i64: 1>}]} {
    %c0_i32 = arith.constant 0 : i32
    %0 = arith.cmpi eq, %arg0, %c0_i32 : i32
    %1 = arith.extui %0 : i1 to i32
    %c0_i32_0 = arith.constant 0 : i32
    %2 = arith.cmpi ne, %1, %c0_i32_0 : i32
    scf.if %2 {
      %cst_43 = arith.constant 0.000000e+00 : f32
      %c0_44 = arith.constant 0 : index
      %81 = memref.load %arg4[%c0_44] : memref<1xf32, #tpu.memory_space<smem>>
      memref.store %cst_43, %arg4[%c0_44] : memref<1xf32, #tpu.memory_space<smem>>
      %cst_45 = arith.constant 0.000000e+00 : f32
      %82 = vector.broadcast %cst_45 : f32 to vector<8x32xf32>
      %c0_46 = arith.constant 0 : index
      %c0_47 = arith.constant 0 : index
      %83 = vector.load %arg5[%c0_46, %c0_47] : memref<8x32xf32, #tpu.memory_space<vmem>>, vector<8x32xf32>
      tpu.vector_store %arg5[%c0_46, %c0_47], %82 {strides = array<i32>} : memref<8x32xf32, #tpu.memory_space<vmem>>, vector<8x32xf32>,
    } else {
    }
    %c0 = arith.constant 0 : index
    %c0_1 = arith.constant 0 : index
    %3 = vector.load %arg1[%c0, %c0_1] : memref<8x32xf32, #tpu.memory_space<vmem>>, vector<8x32xf32>
    %c0_2 = arith.constant 0 : index
    %c0_3 = arith.constant 0 : index
    %4 = vector.load %arg2[%c0_2, %c0_3] : memref<8x32xf32, #tpu.memory_space<vmem>>, vector<8x32xf32>
    %cst = arith.constant 1.000000e+00 : f32
    %5 = vector.broadcast %cst : f32 to vector<32x1xf32>
    %cst_4 = arith.constant dense<0xFF800000> : vector<8xf32>
    %6 = vector.multi_reduction <maximumf>, %3, %cst_4 [1] : vector<8x32xf32> to vector<8xf32>
    %7 = vector.shape_cast %6 : vector<8xf32> to vector<8x1xf32>
    %8 = vector.broadcast %7 : vector<8x1xf32> to vector<8x32xf32>
    %9 = arith.subf %3, %8 : vector<8x32xf32>
    %10 = math.exp %9 : vector<8x32xf32>
    %cst_5 = arith.constant dense<0.000000e+00> : vector<8x1xf32>
    %11 = tpu.matmul %10, %5, %cst_5 {dimension_numbers = #tpu.dot_dimension_numbers<[1], [0], [0], [1], [0, 0, 1, 1], [], []>} : vector<8x32xf32>, vector<32x1xf32>, vector<8x1xf32> -> vector<8x1xf32>
    %12 = tpu.reciprocal %11 : vector<8x1xf32> -> vector<8x1xf32>
    %13 = vector.broadcast %12 : vector<8x1xf32> to vector<8x32xf32>
    %14 = arith.mulf %10, %13 : vector<8x32xf32>
    %cst_6 = arith.constant dense<0xFF800000> : vector<8xf32>
    %15 = vector.multi_reduction <maximumf>, %4, %cst_6 [1] : vector<8x32xf32> to vector<8xf32>
    %16 = vector.shape_cast %15 : vector<8xf32> to vector<8x1xf32>
    %17 = vector.broadcast %16 : vector<8x1xf32> to vector<8x32xf32>
    %18 = arith.subf %4, %17 : vector<8x32xf32>
    %19 = math.exp %18 : vector<8x32xf32>
    %cst_7 = arith.constant dense<0.000000e+00> : vector<8x1xf32>
    %20 = tpu.matmul %19, %5, %cst_7 {dimension_numbers = #tpu.dot_dimension_numbers<[1], [0], [0], [1], [0, 0, 1, 1], [], []>} : vector<8x32xf32>, vector<32x1xf32>, vector<8x1xf32> -> vector<8x1xf32>
    %21 = tpu.reciprocal %20 : vector<8x1xf32> -> vector<8x1xf32>
    %22 = vector.broadcast %21 : vector<8x1xf32> to vector<8x32xf32>
    %23 = arith.mulf %19, %22 : vector<8x32xf32>
    %24 = arith.mulf %14, %23 : vector<8x32xf32>
    %25 = arith.mulf %14, %14 : vector<8x32xf32>
    %26 = arith.mulf %23, %23 : vector<8x32xf32>
    %cst_8 = arith.constant dense<0.000000e+00> : vector<8x1xf32>
    %27 = tpu.matmul %24, %5, %cst_8 {dimension_numbers = #tpu.dot_dimension_numbers<[1], [0], [0], [1], [0, 0, 1, 1], [], []>} : vector<8x32xf32>, vector<32x1xf32>, vector<8x1xf32> -> vector<8x1xf32>
    %cst_9 = arith.constant dense<0.000000e+00> : vector<8x1xf32>
    %28 = tpu.matmul %25, %5, %cst_9 {dimension_numbers = #tpu.dot_dimension_numbers<[1], [0], [0], [1], [0, 0, 1, 1], [], []>} : vector<8x32xf32>, vector<32x1xf32>, vector<8x1xf32> -> vector<8x1xf32>
    %cst_10 = arith.constant dense<0.000000e+00> : vector<8x1xf32>
    %29 = tpu.matmul %26, %5, %cst_10 {dimension_numbers = #tpu.dot_dimension_numbers<[1], [0], [0], [1], [0, 0, 1, 1], [], []>} : vector<8x32xf32>, vector<32x1xf32>, vector<8x1xf32> -> vector<8x1xf32>
    %cst_11 = arith.constant 3.125000e-02 : f32
    %30 = vector.broadcast %cst_11 : f32 to vector<8x1xf32>
    %31 = arith.subf %27, %30 : vector<8x1xf32>
    %cst_12 = arith.constant 3.125000e-02 : f32
    %32 = vector.broadcast %cst_12 : f32 to vector<8x1xf32>
    %33 = arith.subf %28, %32 : vector<8x1xf32>
    %cst_13 = arith.constant 0.000000e+00 : f32
    %34 = vector.broadcast %cst_13 : f32 to vector<8x1xf32>
    %35 = arith.maximumf %33, %34 : vector<8x1xf32>
    %36 = math.sqrt %35 : vector<8x1xf32>
    %cst_14 = arith.constant 3.125000e-02 : f32
    %37 = vector.broadcast %cst_14 : f32 to vector<8x1xf32>
    %38 = arith.subf %29, %37 : vector<8x1xf32>
    %cst_15 = arith.constant 0.000000e+00 : f32
    %39 = vector.broadcast %cst_15 : f32 to vector<8x1xf32>
    %40 = arith.maximumf %38, %39 : vector<8x1xf32>
    %41 = math.sqrt %40 : vector<8x1xf32>
    %42 = arith.mulf %36, %41 : vector<8x1xf32>
    %cst_16 = arith.constant 9.99999993E-9 : f32
    %43 = vector.broadcast %cst_16 : f32 to vector<8x1xf32>
    %44 = arith.addf %42, %43 : vector<8x1xf32>
    %45 = arith.divf %31, %44 : vector<8x1xf32>
    %c0_17 = arith.constant 0 : index
    %46 = memref.load %arg4[%c0_17] : memref<1xf32, #tpu.memory_space<smem>>
    %47 = vector.shape_cast %45 : vector<8x1xf32> to vector<1x8x1xf32>
    %cst_18 = arith.constant dense<0.000000e+00> : vector<1xf32>
    %48 = vector.multi_reduction <add>, %47, %cst_18 [1, 2] : vector<1x8x1xf32> to vector<1xf32>
    %49 = vector.shape_cast %48 : vector<1xf32> to vector<1x1x1xf32>
    %50 = vector.extract %49[0, 0, 0] : f32 from vector<1x1x1xf32>
    %51 = arith.addf %46, %50 : f32
    %c0_19 = arith.constant 0 : index
    %52 = memref.load %arg4[%c0_19] : memref<1xf32, #tpu.memory_space<smem>>
    memref.store %51, %arg4[%c0_19] : memref<1xf32, #tpu.memory_space<smem>>
    %c0_20 = arith.constant 0 : index
    %c0_21 = arith.constant 0 : index
    %53 = vector.load %arg5[%c0_20, %c0_21] : memref<8x32xf32, #tpu.memory_space<vmem>>, vector<1x32xf32>
    %cst_22 = arith.constant dense<0.000000e+00> : vector<32xf32>
    %54 = vector.multi_reduction <add>, %14, %cst_22 [0] : vector<8x32xf32> to vector<32xf32>
    %55 = vector.shape_cast %54 : vector<32xf32> to vector<1x32xf32>
    %56 = arith.addf %53, %55 : vector<1x32xf32>
    %c0_23 = arith.constant 0 : index
    %c0_24 = arith.constant 0 : index
    %57 = vector.load %arg5[%c0_23, %c0_24] : memref<8x32xf32, #tpu.memory_space<vmem>>, vector<1x32xf32>
    tpu.vector_store %arg5[%c0_23, %c0_24], %56 {strides = array<i32>} : memref<8x32xf32, #tpu.memory_space<vmem>>, vector<1x32xf32>,
    %c1 = arith.constant 1 : index
    %c0_25 = arith.constant 0 : index
    %58 = vector.load %arg5[%c1, %c0_25] : memref<8x32xf32, #tpu.memory_space<vmem>>, vector<1x32xf32>
    %cst_26 = arith.constant dense<0.000000e+00> : vector<32xf32>
    %59 = vector.multi_reduction <add>, %23, %cst_26 [0] : vector<8x32xf32> to vector<32xf32>
    %60 = vector.shape_cast %59 : vector<32xf32> to vector<1x32xf32>
    %61 = arith.addf %58, %60 : vector<1x32xf32>
    %c1_27 = arith.constant 1 : index
    %c0_28 = arith.constant 0 : index
    %62 = vector.load %arg5[%c1_27, %c0_28] : memref<8x32xf32, #tpu.memory_space<vmem>>, vector<1x32xf32>
    tpu.vector_store %arg5[%c1_27, %c0_28], %61 {strides = array<i32>} : memref<8x32xf32, #tpu.memory_space<vmem>>, vector<1x32xf32>,
    %c2 = arith.constant 2 : index
    %c0_29 = arith.constant 0 : index
    %63 = vector.load %arg5[%c2, %c0_29] : memref<8x32xf32, #tpu.memory_space<vmem>>, vector<1x32xf32>
    %cst_30 = arith.constant dense<0.000000e+00> : vector<32xf32>
    %64 = vector.multi_reduction <add>, %24, %cst_30 [0] : vector<8x32xf32> to vector<32xf32>
    %65 = vector.shape_cast %64 : vector<32xf32> to vector<1x32xf32>
    %66 = arith.addf %63, %65 : vector<1x32xf32>
    %c2_31 = arith.constant 2 : index
    %c0_32 = arith.constant 0 : index
    %67 = vector.load %arg5[%c2_31, %c0_32] : memref<8x32xf32, #tpu.memory_space<vmem>>, vector<1x32xf32>
    tpu.vector_store %arg5[%c2_31, %c0_32], %66 {strides = array<i32>} : memref<8x32xf32, #tpu.memory_space<vmem>>, vector<1x32xf32>,
    %c3 = arith.constant 3 : index
    %c0_33 = arith.constant 0 : index
    %68 = vector.load %arg5[%c3, %c0_33] : memref<8x32xf32, #tpu.memory_space<vmem>>, vector<1x32xf32>
    %cst_34 = arith.constant dense<0.000000e+00> : vector<32xf32>
    %69 = vector.multi_reduction <add>, %25, %cst_34 [0] : vector<8x32xf32> to vector<32xf32>
    %70 = vector.shape_cast %69 : vector<32xf32> to vector<1x32xf32>
    %71 = arith.addf %68, %70 : vector<1x32xf32>
    %c3_35 = arith.constant 3 : index
    %c0_36 = arith.constant 0 : index
    %72 = vector.load %arg5[%c3_35, %c0_36] : memref<8x32xf32, #tpu.memory_space<vmem>>, vector<1x32xf32>
    tpu.vector_store %arg5[%c3_35, %c0_36], %71 {strides = array<i32>} : memref<8x32xf32, #tpu.memory_space<vmem>>, vector<1x32xf32>,
    %c4 = arith.constant 4 : index
    %c0_37 = arith.constant 0 : index
    %73 = vector.load %arg5[%c4, %c0_37] : memref<8x32xf32, #tpu.memory_space<vmem>>, vector<1x32xf32>
    %cst_38 = arith.constant dense<0.000000e+00> : vector<32xf32>
    %74 = vector.multi_reduction <add>, %26, %cst_38 [0] : vector<8x32xf32> to vector<32xf32>
    %75 = vector.shape_cast %74 : vector<32xf32> to vector<1x32xf32>
    %76 = arith.addf %73, %75 : vector<1x32xf32>
    %c4_39 = arith.constant 4 : index
    %c0_40 = arith.constant 0 : index
    %77 = vector.load %arg5[%c4_39, %c0_40] : memref<8x32xf32, #tpu.memory_space<vmem>>, vector<1x32xf32>
    tpu.vector_store %arg5[%c4_39, %c0_40], %76 {strides = array<i32>} : memref<8x32xf32, #tpu.memory_space<vmem>>, vector<1x32xf32>,
    %c0_i32_41 = arith.constant 0 : i32
    %78 = arith.cmpi eq, %arg0, %c0_i32_41 : i32
    %79 = arith.extui %78 : i1 to i32
    %c0_i32_42 = arith.constant 0 : i32
    %80 = arith.cmpi ne, %79, %c0_i32_42 : i32
    scf.if %80 {
      %c0_43 = arith.constant 0 : index
      %c0_44 = arith.constant 0 : index
      %81 = vector.load %arg5[%c0_43, %c0_44] : memref<8x32xf32, #tpu.memory_space<vmem>>, vector<1x32xf32>
      %c1_45 = arith.constant 1 : index
      %c0_46 = arith.constant 0 : index
      %82 = vector.load %arg5[%c1_45, %c0_46] : memref<8x32xf32, #tpu.memory_space<vmem>>, vector<1x32xf32>
      %c2_47 = arith.constant 2 : index
      %c0_48 = arith.constant 0 : index
      %83 = vector.load %arg5[%c2_47, %c0_48] : memref<8x32xf32, #tpu.memory_space<vmem>>, vector<1x32xf32>
      %c3_49 = arith.constant 3 : index
      %c0_50 = arith.constant 0 : index
      %84 = vector.load %arg5[%c3_49, %c0_50] : memref<8x32xf32, #tpu.memory_space<vmem>>, vector<1x32xf32>
      %c4_51 = arith.constant 4 : index
      %c0_52 = arith.constant 0 : index
      %85 = vector.load %arg5[%c4_51, %c0_52] : memref<8x32xf32, #tpu.memory_space<vmem>>, vector<1x32xf32>
      %86 = arith.mulf %81, %82 : vector<1x32xf32>
      %cst_53 = arith.constant 8.000000e+00 : f32
      %87 = vector.broadcast %cst_53 : f32 to vector<1x32xf32>
      %88 = arith.divf %86, %87 : vector<1x32xf32>
      %89 = arith.subf %83, %88 : vector<1x32xf32>
      %90 = arith.mulf %81, %81 : vector<1x32xf32>
      %cst_54 = arith.constant 8.000000e+00 : f32
      %91 = vector.broadcast %cst_54 : f32 to vector<1x32xf32>
      %92 = arith.divf %90, %91 : vector<1x32xf32>
      %93 = arith.subf %84, %92 : vector<1x32xf32>
      %cst_55 = arith.constant 0.000000e+00 : f32
      %94 = vector.broadcast %cst_55 : f32 to vector<1x32xf32>
      %95 = arith.maximumf %93, %94 : vector<1x32xf32>
      %96 = arith.mulf %82, %82 : vector<1x32xf32>
      %cst_56 = arith.constant 8.000000e+00 : f32
      %97 = vector.broadcast %cst_56 : f32 to vector<1x32xf32>
      %98 = arith.divf %96, %97 : vector<1x32xf32>
      %99 = arith.subf %85, %98 : vector<1x32xf32>
      %cst_57 = arith.constant 0.000000e+00 : f32
      %100 = vector.broadcast %cst_57 : f32 to vector<1x32xf32>
      %101 = arith.maximumf %99, %100 : vector<1x32xf32>
      %102 = math.sqrt %95 : vector<1x32xf32>
      %103 = math.sqrt %101 : vector<1x32xf32>
      %104 = arith.mulf %102, %103 : vector<1x32xf32>
      %cst_58 = arith.constant 9.99999993E-9 : f32
      %105 = vector.broadcast %cst_58 : f32 to vector<1x32xf32>
      %106 = arith.addf %104, %105 : vector<1x32xf32>
      %107 = arith.divf %89, %106 : vector<1x32xf32>
      %108 = vector.shape_cast %107 : vector<1x32xf32> to vector<1x1x32xf32>
      %cst_59 = arith.constant dense<0.000000e+00> : vector<1xf32>
      %109 = vector.multi_reduction <add>, %108, %cst_59 [1, 2] : vector<1x1x32xf32> to vector<1xf32>
      %110 = vector.shape_cast %109 : vector<1xf32> to vector<1x1x1xf32>
      %111 = vector.extract %110[0, 0, 0] : f32 from vector<1x1x1xf32>
      %cst_60 = arith.constant 3.200000e+01 : f32
      %112 = arith.divf %111, %cst_60 : f32
      %c0_61 = arith.constant 0 : index
      %113 = memref.load %arg4[%c0_61] : memref<1xf32, #tpu.memory_space<smem>>
      %cst_62 = arith.constant 8.000000e+00 : f32
      %114 = arith.divf %113, %cst_62 : f32
      %cst_63 = arith.constant 1.000000e+00 : f32
      %cst_64 = arith.constant 1.000000e+00 : f32
      %115 = arith.mulf %cst_63, %cst_64 : f32
      %cst_65 = arith.constant 1.000000e+00 : f32
      %116 = arith.subf %cst_65, %114 : f32
      %117 = arith.mulf %115, %116 : f32
      %cst_66 = arith.constant 1.000000e+00 : f32
      %cst_67 = arith.constant 1.000000e+00 : f32
      %118 = arith.mulf %cst_66, %cst_67 : f32
      %cst_68 = arith.constant 1.000000e+00 : f32
      %119 = arith.subf %cst_68, %112 : f32
      %120 = arith.mulf %118, %119 : f32
      %121 = arith.addf %117, %120 : f32
      %c0_69 = arith.constant 0 : index
      %122 = memref.load %arg3[%c0_69] : memref<1xf32, #tpu.memory_space<smem>>
      memref.store %121, %arg3[%c0_69] : memref<1xf32, #tpu.memory_space<smem>>
    } else {
    }
    return
  }
  func.func @transform_0(%arg0: i32) -> (i32, i32) {
    %c0_i32 = arith.constant 0 : i32
    %c0_i32_0 = arith.constant 0 : i32
    return %arg0, %c0_i32 : i32, i32
  }
  func.func @transform_1(%arg0: i32) -> (i32, i32) {
    %c0_i32 = arith.constant 0 : i32
    %c0_i32_0 = arith.constant 0 : i32
    return %arg0, %c0_i32 : i32, i32
  }
  func.func @transform_2(%arg0: i32) -> i32 {
    %c0_i32 = arith.constant 0 : i32
    %c0_i32_0 = arith.constant 0 : i32
    return %c0_i32 : i32
  }
}

</mosaic_0001>

<bundles_post_ra>
// kernel: tpu_custom_call.1
= control target key start
LH: loop header
LB: loop body
LE: loop exit
PB: predicated region body
PF: predicated region fallthrough
CT: control target
= control target key end

     0   :  { %7 = vsyncpa [#allocation5], 0  ;;  %s634_s0 = inlined_call_operand.hbm [shape: f32[8,32], index: 0, kind: input, shape index: {}]   ;;  %s635_s1 = inlined_call_operand.hbm [shape: f32[8,32], index: 1, kind: input, shape index: {}]   ;;  %s636_s2 = inlined_call_operand.hbm [shape: f32[1], index: 2, kind: output, shape index: {}]  }
   0x1   :  { %8 = vsyncpa [#allocation8], 0 }
   0x2   :  { %9 = vsyncpa [#allocation6], 0  ;;  %s15_s11 = sshll.u32 %s634_s0, 4  ;;  %s567_s12 = smov [#allocation4]   ;;  %s16_s11 = int_to_ptr.hbm [resolvable:$true] %s15_s11 }
   0x3   :  { %s17_s13 = sshll.u32 %s567_s12, 4  ;;  %s26_s16 = sshll.u32 %s635_s1, 4  ;;  %s18_s13 = int_to_ptr.vmem [resolvable:$true] %s17_s13  ;;  %s27_s16 = int_to_ptr.hbm [resolvable:$true] %s26_s16 }
   0x4   :  { %20 = dma.hbm_to_vmem [thread:$0]  %s16_s11, 128, %s18_s13, [#allocation5]  }
   0x5   :  { %s568_s17 = smov [#allocation7]  }
   0x6   :  { %s28_s18 = sshll.u32 %s568_s17, 4  ;;  %s29_s18 = int_to_ptr.vmem [resolvable:$true] %s28_s18 }
   0x7   :  { %31 = dma.hbm_to_vmem [thread:$0]  %s27_s16, 128, %s29_s18, [#allocation8]  }
   0x8   :  { %561 = dma.done.wait [#allocation5], 128  }
   0x9   :  { %562 = vsyncadd [#allocation5], 4294967168 }
   0xa   :  { %563 = dma.done.wait [#allocation8], 128  }
   0xb   :  { %564 = vsyncadd [#allocation8], 4294967168  ;;  %vm46_vm0 = vcmask 261120   ;;  %v48_v0 = vld [vmem:[#allocation4] sm:$0xff]  ;;  %v49_v2 = vld [vmem:[#allocation7] sm:$0xff]  ;;  %v569_v4 = vmov 1.0  }
   0xc   :  { %v51_v1 = vsel %vm46_vm0, %v48_v0, -inf  ;;  %v100_v3 = vsel %vm46_vm0, %v49_v2, -inf  ;;  %72 = vmatpush.msra.mxu0 %v569_v4  ;;  %121 = vmatpush.msra.mxu1 %v569_v4  ;;  %v570_v13 = vmov 0   ;;  %v571_v14 = vmov 0.0   ;;  %s439_s25 = sshll.u32 %s636_s2, 4  ;;  %s574_s29 = smov [#allocation9]   ;;  %s440_s25 = int_to_ptr.hbm [resolvable:$true] %s439_s25 }
   0xd   :  { %52 = vmax.xlane.f32.xlu0 %v51_v1  ;;  %190 = vmatpush.msra.mxu3 %v569_v4  ;;  %47 = vst.msk [vmem:[#allocation3] sm:$0xff] %vm46_vm0, %v571_v14  ;;  %vm291_vm9 = vcmask 253952  }
   0xe   :  { %167 = vmatpush.msra.mxu2 %v569_v4  ;;  %73 = vmatpush.msra.mxu0 %v569_v4 }
   0xf   :  { %122 = vmatpush.msra.mxu1 %v569_v4  ;;  %191 = vmatpush.msra.mxu3 %v569_v4 }
  0x10   :  { %168 = vmatpush.msra.mxu2 %v569_v4  ;;  %74 = vmatpush.msra.mxu0 %v569_v4 }
  0x11   :  { %123 = vmatpush.msra.mxu1 %v569_v4  ;;  %192 = vmatpush.msra.mxu3 %v569_v4 }
  0x12   :  { %169 = vmatpush.msra.mxu2 %v569_v4  ;;  %75 = vmatpush.msra.mxu0 %v569_v4 }
  0x13   :  { %124 = vmatpush.msra.mxu1 %v569_v4  ;;  %193 = vmatpush.msra.mxu3 %v569_v4 }
  0x14   :  { %213 = vmatpush.msrb.mxu0 %v569_v4  ;;  %170 = vmatpush.msra.mxu2 %v569_v4  ;;  %v282_v57 = vld [vmem:[#allocation3] sm:$0x1] }
  0x15   :  { %101 = vmax.xlane.f32.xlu0 %v100_v3  ;;  %475 = vset.pattern.permute.xlu1 %v570_v13 }
  0x16   :  { %214 = vmatpush.msrb.mxu0 %v569_v4  ;;  %476 = vset.pattern.permute.xlu0 %v570_v13  ;;  %v293_v13 = vld [vmem:[#allocation3 + $0x1] sm:$0x1] }
  0x18   :  { %215 = vmatpush.msrb.mxu0 %v569_v4 }
  0x1a   :  { %216 = vmatpush.msrb.mxu0 %v569_v4 }
  0x80   :  { %v53_v5 = vpop.xlane.xlu0 %52 }
  0x81   :  { %v54_v6 = vsub.f32 %v48_v0, %v53_v5  ;;  %v313_v0 = vld [vmem:[#allocation3 + $0x3] sm:$0x1] }
  0x83   :  { %v55_v7 = vmul.f32 1.442695, %v54_v6 }
  0x85   :  { %477 = vpow2.f32 %v55_v7 }
  0x88   :  { %v102_v8 = vpop.xlane.xlu0 %101 }
  0x89   :  { %v103_v9 = vsub.f32 %v49_v2, %v102_v8 }
  0x8b   :  { %v478_v10 = vpop.eup %477  ;;  %v104_v11 = vmul.f32 1.442695, %v103_v9 }
  0x8c   :  { %451 = vmatmul.msk.f32.vlgmr.msra.gmra.mxu0 %vm46_vm0, %v478_v10 }
  0x8d   :  { %479 = vpow2.f32 %v104_v11 }
  0x93   :  { %v480_v12 = vpop.eup %479 }
  0x94   :  { %452 = vmatmul.msk.f32.vlgmr.msra.gmra.mxu1 %vm46_vm0, %v480_v12 }
 0x109   :  { %v77_v15 = vpop.f32.mrf.mxu0 }
 0x10a   :  { %481 = vrcp.f32 %v77_v15  ;;  %v91_v20 = vand.u32 2147483648, %v77_v15  ;;  %v89_v22 = vand.u32 2147483647, %v77_v15  ;;  %vm85_vm2 = vweird.f32 %v77_v15 }
 0x10c   :  { %v92_v25 = vor.u32 1.1754944e-38, %v91_v20  ;;  %vm90_vm4 = vcmp.eq.f32.partialorder %v89_v22, 8.507059e+37 }
 0x110   :  { %v482_v16 = vpop.eup %481 }
 0x111   :  { %v81_v17 = vmul.f32 %v482_v16, %v77_v15  ;;  %v126_v18 = vpop.f32.mrf.mxu1  ;;  %vm86_vm1 = vweird.f32 %v482_v16 }
 0x112   :  { %483 = vrcp.f32 %v126_v18  ;;  %vm87_vm3 = vmor %vm85_vm2, %vm86_vm1  ;;  %v140_v30 = vand.u32 2147483648, %v126_v18  ;;  %v138_v32 = vand.u32 2147483647, %v126_v18  ;;  %vm134_vm6 = vweird.f32 %v126_v18 }
 0x113   :  { %v82_v19 = vsub.f32 1.0, %v81_v17  ;;  %v323_v17 = vld [vmem:[#allocation3 + $0x4] sm:$0x1] }
 0x114   :  { %v141_v34 = vor.u32 1.1754944e-38, %v140_v30  ;;  %vm139_vm8 = vcmp.eq.f32.partialorder %v138_v32, 8.507059e+37 }
 0x115   :  { %v83_v21 = vmul.f32 %v482_v16, %v82_v19 }
 0x117   :  { %v84_v23 = vadd.f32 %v482_v16, %v83_v21  ;;  %v303_v21 = vld [vmem:[#allocation3 + $0x2] sm:$0x1] }
 0x118   :  { %v484_v24 = vpop.eup %483 }
 0x119   :  { %v130_v26 = vmul.f32 %v484_v24, %v126_v18  ;;  %v88_v27 = vsel %vm87_vm3, %v482_v16, %v84_v23  ;;  %vm135_vm5 = vweird.f32 %v484_v24 }
 0x11a   :  { %v93_v28 = vsel %vm90_vm4, %v92_v25, %v88_v27  ;;  %vm136_vm7 = vmor %vm134_vm6, %vm135_vm5  ;;  %v572_v25 = vmov 8.0  }
 0x11b   :  { %v131_v29 = vsub.f32 1.0, %v130_v26  ;;  %96 = vperm.xlu1 %475, %v93_v28   ;;  %485 = vrcp.f32 %v572_v25 }
 0x11d   :  { %v132_v31 = vmul.f32 %v484_v24, %v131_v29 }
 0x11f   :  { %v133_v33 = vadd.f32 %v484_v24, %v132_v31 }
 0x121   :  { %v137_v35 = vsel %vm136_vm7, %v484_v24, %v133_v33  ;;  %v486_v26 = vpop.eup %485 }
 0x122   :  { %v142_v36 = vsel %vm139_vm8, %v141_v34, %v137_v35  ;;  %v343_v27 = vmul.f32 8.0, %v486_v26  ;;  %vm347_vm10 = vweird.f32 %v486_v26 }
 0x123   :  { %145 = vperm.xlu1 %475, %v142_v36  }
 0x124   :  { %v344_v28 = vsub.f32 1.0, %v343_v27 }
 0x126   :  { %v345_v29 = vmul.f32 %v486_v26, %v344_v28 }
 0x128   :  { %v346_v32 = vadd.f32 %v486_v26, %v345_v29 }
 0x12a   :  { %v622_v35 = vsel %vm347_vm10, %v486_v26, %v346_v32  ;;  %vm268_vm10 = vcmask 7168  }
 0x18d   :  { %v97_v37 = vpop.permute.xlu1 %96 }
 0x18e   :  { %v99_v38 = vmul.f32 %v478_v10, %v97_v37 }
 0x190   :  { %v283_v39 = vsel %vm46_vm0, %v99_v38, 0.0  ;;  %v150_v40 = vmul.f32 %v99_v38, %v99_v38 }
 0x191   :  { %v284_v41 = vrot.slane %v283_v39, 4 }
 0x192   :  { %454 = vmatmul.msk.f32.vlgmr.msra.gmra.mxu3 %vm46_vm0, %v150_v40  ;;  %v314_v42 = vsel %vm46_vm0, %v150_v40, 0.0 }
 0x193   :  { %v285_v43 = vadd.f32 %v284_v41, %v283_v39  ;;  %v315_v44 = vrot.slane %v314_v42, 4 }
 0x195   :  { %v286_v45 = vrot.slane %v285_v43, 2  ;;  %v316_v46 = vadd.f32 %v315_v44, %v314_v42  ;;  %v146_v47 = vpop.permute.xlu1 %145 }
 0x196   :  { %v148_v48 = vmul.f32 %v480_v12, %v146_v47 }
 0x197   :  { %v287_v49 = vadd.f32 %v286_v45, %v285_v43  ;;  %v317_v50 = vrot.slane %v316_v46, 2 }
 0x198   :  { %v151_v51 = vmul.f32 %v148_v48, %v148_v48  ;;  %v294_v52 = vsel %vm46_vm0, %v148_v48, 0.0  ;;  %v149_v53 = vmul.f32 %v148_v48, %v99_v38 }
 0x199   :  { %v288_v54 = vrot.slane %v287_v49, 1  ;;  %v318_v55 = vadd.f32 %v317_v50, %v316_v46  ;;  %v295_v56 = vrot.slane %v294_v52, 4 }
 0x19a   :  { %v324_v58 = vsel %vm46_vm0, %v151_v51, 0.0  ;;  %453 = vmatmul.msk.f32.vlgmr.msra.gmra.mxu2 %vm46_vm0, %v149_v53  ;;  %v304_v59 = vsel %vm46_vm0, %v149_v53, 0.0  ;;  %455 = vmatmul.msk.f32.vlgmr.msrb.gmra.mxu0 %vm46_vm0, %v151_v51 }
 0x19b   :  { %v289_v60 = vadd.f32 %v288_v54, %v287_v49  ;;  %v319_v61 = vrot.slane %v318_v55, 1  ;;  %v296_v62 = vadd.f32 %v295_v56, %v294_v52  ;;  %v325_v63 = vrot.slane %v324_v58, 4 }
 0x19c   :  { %v305_v1 = vrot.slane %v304_v59, 4 }
 0x19d   :  { %v290_v2 = vadd.f32 %v289_v60, %v282_v57  ;;  %v320_v3 = vadd.f32 %v319_v61, %v318_v55  ;;  %v297_v4 = vrot.slane %v296_v62, 2  ;;  %v326_v5 = vadd.f32 %v325_v63, %v324_v58 }
 0x19e   :  { %v306_v6 = vadd.f32 %v305_v1, %v304_v59 }
 0x19f   :  { %v321_v7 = vadd.f32 %v320_v3, %v313_v0  ;;  %v298_v8 = vadd.f32 %v297_v4, %v296_v62  ;;  %v327_v9 = vrot.slane %v326_v5, 2  ;;  %292 = vst.msk [vmem:[#allocation3] sm:$0x1] %vm291_vm9, %v290_v2 }
 0x1a0   :  { %v307_v10 = vrot.slane %v306_v6, 2 }
 0x1a1   :  { %v299_v11 = vrot.slane %v298_v8, 1  ;;  %v328_v12 = vadd.f32 %v327_v9, %v326_v5  ;;  %322 = vst.msk [vmem:[#allocation3 + $0x3] sm:$0x1] %vm291_vm9, %v321_v7 }
 0x1a2   :  { %v308_v14 = vadd.f32 %v307_v10, %v306_v6 }
 0x1a3   :  { %v300_v15 = vadd.f32 %v299_v11, %v298_v8  ;;  %v329_v16 = vrot.slane %v328_v12, 1 }
 0x1a4   :  { %v309_v18 = vrot.slane %v308_v14, 1 }
 0x1a5   :  { %v301_v19 = vadd.f32 %v300_v15, %v293_v13  ;;  %v330_v20 = vadd.f32 %v329_v16, %v328_v12 }
 0x1a6   :  { %v310_v22 = vadd.f32 %v309_v18, %v308_v14  ;;  %v616_v31 = vld [vmem:[#allocation3] sm:$0x1] }
 0x1a7   :  { %v331_v23 = vadd.f32 %v330_v20, %v323_v17  ;;  %302 = vst.msk [vmem:[#allocation3 + $0x1] sm:$0x1] %vm291_vm9, %v301_v19  ;;  %v351_v34 = vmul.f32 %v616_v31, %v616_v31 }
 0x1a8   :  { %v311_v24 = vadd.f32 %v310_v22, %v303_v21  ;;  %v339_v40 = vld [vmem:[#allocation3 + $0x3] sm:$0x1] }
 0x1a9   :  { %332 = vst.msk [vmem:[#allocation3 + $0x4] sm:$0x1] %vm291_vm9, %v331_v23  ;;  %v352_v37 = vmul.f32 %v351_v34, %v622_v35 }
 0x1aa   :  { %312 = vst.msk [vmem:[#allocation3 + $0x2] sm:$0x1] %vm291_vm9, %v311_v24 }
 0x1ab   :  { %v353_v41 = vsub.f32 %v339_v40, %v352_v37 }
 0x1ad   :  { %v354_v43 = vmax.f32 %v353_v41, 0.0 }
 0x1ae   :  { %v614_v30 = vld [vmem:[#allocation3 + $0x1] sm:$0x1] }
 0x1af   :  { %v355_v33 = vmul.f32 %v614_v30, %v614_v30  ;;  %vm366_vm12 = vcmp.eq.f32.partialorder %v354_v43, inf  ;;  %v369_v6 = vand.u32 2147483648, %v354_v43  ;;  %vm368_vm14 = vcmp.eq.f32.partialorder %v354_v43, 0.0 }
 0x1b0   :  { %v340_v38 = vld [vmem:[#allocation3 + $0x4] sm:$0x1] }
 0x1b1   :  { %v356_v36 = vmul.f32 %v355_v33, %v622_v35 }
 0x1b3   :  { %v357_v39 = vsub.f32 %v340_v38, %v356_v36 }
 0x1b5   :  { %v358_v42 = vmax.f32 %v357_v39, 0.0 }
 0x1b7   :  { %487 = vrsqrt.f32 %v358_v42  ;;  %vm378_vm11 = vcmp.eq.f32.partialorder %v358_v42, inf  ;;  %v381_v2 = vand.u32 2147483648, %v358_v42  ;;  %vm380_vm13 = vcmp.eq.f32.partialorder %v358_v42, 0.0 }
 0x1b8   :  { %489 = vrsqrt.f32 %v354_v43 }
 0x1bd   :  { %v488_v44 = vpop.eup %487 }
 0x1be   :  { %v490_v45 = vpop.eup %489  ;;  %v372_v46 = vmul.f32 %v488_v44, %v358_v42 }
 0x1bf   :  { %v360_v47 = vmul.f32 %v490_v45, %v354_v43 }
 0x1c0   :  { %v373_v48 = vmul.f32 %v488_v44, %v372_v46 }
 0x1c1   :  { %v361_v49 = vmul.f32 %v490_v45, %v360_v47 }
 0x1c2   :  { %v374_v50 = vmul.f32 0.5, %v373_v48 }
 0x1c3   :  { %v362_v51 = vmul.f32 0.5, %v361_v49 }
 0x1c4   :  { %v375_v52 = vsub.f32 1.5, %v374_v50 }
 0x1c5   :  { %v363_v54 = vsub.f32 1.5, %v362_v51 }
 0x1c6   :  { %v376_v57 = vmul.f32 %v488_v44, %v375_v52  ;;  %v341_v44 = vmul.f32 %v614_v30, %v616_v31 }
 0x1c7   :  { %v364_v60 = vmul.f32 %v490_v45, %v363_v54 }
 0x1c8   :  { %v377_v62 = vmul.f32 %v376_v57, %v358_v42  ;;  %v349_v54 = vmul.f32 %v622_v35, %v341_v44 }
 0x1c9   :  { %v365_v63 = vmul.f32 %v364_v60, %v354_v43 }
 0x1ca   :  { %v379_v0 = vsel %vm378_vm11, %v358_v42, %v377_v62 }
 0x1cb   :  { %v367_v4 = vsel %vm366_vm12, %v354_v43, %v365_v63  ;;  %v382_v7 = vsel %vm380_vm13, %v381_v2, %v379_v0 }
 0x1cc   :  { %v370_v10 = vsel %vm368_vm14, %v369_v6, %v367_v4 }
 0x1cd   :  { %v383_v13 = vmul.f32 %v382_v7, %v370_v10 }
 0x1cf   :  { %v384_v18 = vadd.f32 1e-08, %v383_v13 }
 0x1d1   :  { %vm390_vm7 = vweird.f32 %v384_v18  ;;  %v396_v48 = vand.u32 2147483648, %v384_v18  ;;  %v394_v51 = vand.u32 2147483647, %v384_v18 }
 0x1d3   :  { %v397_v30 = vor.u32 1.1754944e-38, %v396_v48  ;;  %vm395_vm12 = vcmp.eq.f32.partialorder %v394_v51, 8.507059e+37 }
 0x215   :  { %v195_v53 = vpop.f32.mrf.mxu3 }
 0x216   :  { %v457_v55 = vadd.f32 -0.03125, %v195_v53 }
 0x217   :  { %v218_v56 = vpop.f32.mrf.mxu0 }
 0x218   :  { %v223_v58 = vmax.f32 %v457_v55, 0.0  ;;  %v458_v59 = vadd.f32 -0.03125, %v218_v56  ;;  %v338_v56 = vld [vmem:[#allocation3 + $0x2] sm:$0x1] }
 0x21a   :  { %491 = vrsqrt.f32 %v223_v58  ;;  %v237_v61 = vmax.f32 %v458_v59, 0.0  ;;  %vm231_vm15 = vcmp.eq.f32.partialorder %v223_v58, inf  ;;  %v234_v23 = vand.u32 2147483648, %v223_v58 }
 0x21b   :  { %vm233_vm1 = vcmp.eq.f32.partialorder %v223_v58, 0.0 }
 0x21c   :  { %493 = vrsqrt.f32 %v237_v61  ;;  %vm245_vm0 = vcmp.eq.f32.partialorder %v237_v61, inf  ;;  %v248_v24 = vand.u32 2147483648, %v237_v61  ;;  %vm247_vm2 = vcmp.eq.f32.partialorder %v237_v61, 0.0 }
 0x21d   :  { %495 = vrcp.f32 %v384_v18  ;;  %v172_v43 = vpop.f32.mrf.mxu2 }
 0x21e   :  { %v456_v49 = vadd.f32 -0.03125, %v172_v43 }
 0x220   :  { %v492_v1 = vpop.eup %491 }
 0x221   :  { %v225_v3 = vmul.f32 %v492_v1, %v223_v58 }
 0x222   :  { %v494_v5 = vpop.eup %493 }
 0x223   :  { %v226_v8 = vmul.f32 %v492_v1, %v225_v3  ;;  %v239_v9 = vmul.f32 %v494_v5, %v237_v61  ;;  %v496_v29 = vpop.eup %495 }
 0x224   :  { %v386_v33 = vmul.f32 %v496_v29, %v384_v18  ;;  %vm391_vm5 = vweird.f32 %v496_v29 }
 0x225   :  { %v227_v11 = vmul.f32 0.5, %v226_v8  ;;  %v240_v12 = vmul.f32 %v494_v5, %v239_v9  ;;  %vm392_vm11 = vmor %vm390_vm7, %vm391_vm5 }
 0x226   :  { %v387_v34 = vsub.f32 1.0, %v386_v33 }
 0x227   :  { %v228_v14 = vsub.f32 1.5, %v227_v11  ;;  %v241_v15 = vmul.f32 0.5, %v240_v12 }
 0x228   :  { %v388_v39 = vmul.f32 %v496_v29, %v387_v34 }
 0x229   :  { %v229_v16 = vmul.f32 %v492_v1, %v228_v14  ;;  %v242_v17 = vsub.f32 1.5, %v241_v15 }
 0x22a   :  { %v389_v46 = vadd.f32 %v496_v29, %v388_v39 }
 0x22b   :  { %v230_v19 = vmul.f32 %v229_v16, %v223_v58  ;;  %v243_v20 = vmul.f32 %v494_v5, %v242_v17 }
 0x22c   :  { %v393_v55 = vsel %vm392_vm11, %v496_v29, %v389_v46 }
 0x22d   :  { %v244_v21 = vmul.f32 %v243_v20, %v237_v61  ;;  %v232_v22 = vsel %vm231_vm15, %v223_v58, %v230_v19  ;;  %v398_v57 = vsel %vm395_vm12, %v397_v30, %v393_v55  ;;  %v350_v58 = vsub.f32 %v338_v56, %v349_v54 }
 0x22e   :  { %v235_v26 = vsel %vm233_vm1, %v234_v23, %v232_v22 }
 0x22f   :  { %v246_v25 = vsel %vm245_vm0, %v237_v61, %v244_v21  ;;  %v399_v59 = vmul.f32 %v398_v57, %v350_v58  ;;  %v573_v61 = vmov 32.0  }
 0x230   :  { %v249_v27 = vsel %vm247_vm2, %v248_v24, %v246_v25 }
 0x231   :  { %v250_v28 = vmul.f32 %v249_v27, %v235_v26  ;;  %v400_v60 = vsel %vm291_vm9, %v399_v59, 0.0 }
 0x233   :  { %v251_v32 = vadd.f32 1e-08, %v250_v28 }
 0x235   :  { %497 = vrcp.f32 %v251_v32  ;;  %v263_v40 = vand.u32 2147483648, %v251_v32  ;;  %v261_v42 = vand.u32 2147483647, %v251_v32  ;;  %vm257_vm4 = vweird.f32 %v251_v32 }
 0x236   :  { %499 = vrcp.f32 %v573_v61 }
 0x237   :  { %v264_v47 = vor.u32 1.1754944e-38, %v263_v40  ;;  %vm262_vm8 = vcmp.eq.f32.partialorder %v261_v42, 8.507059e+37 }
 0x23b   :  { %v498_v36 = vpop.eup %497 }
 0x23c   :  { %v253_v37 = vmul.f32 %v498_v36, %v251_v32  ;;  %vm258_vm3 = vweird.f32 %v498_v36  ;;  %v500_v62 = vpop.eup %499 }
 0x23d   :  { %vm259_vm6 = vmor %vm257_vm4, %vm258_vm3  ;;  %v411_v2 = vmul.f32 32.0, %v500_v62  ;;  %vm415_vm9 = vweird.f32 %v500_v62 }
 0x23e   :  { %v254_v38 = vsub.f32 1.0, %v253_v37 }
 0x23f   :  { %v412_v5 = vsub.f32 1.0, %v411_v2 }
 0x240   :  { %v255_v41 = vmul.f32 %v498_v36, %v254_v38 }
 0x241   :  { %v413_v11 = vmul.f32 %v500_v62, %v412_v5 }
 0x242   :  { %v256_v45 = vadd.f32 %v498_v36, %v255_v41 }
 0x243   :  { %v414_v14 = vadd.f32 %v500_v62, %v413_v11 }
 0x244   :  { %v260_v50 = vsel %vm259_vm6, %v498_v36, %v256_v45 }
 0x245   :  { %v265_v52 = vsel %vm262_vm8, %v264_v47, %v260_v50  ;;  %v416_v17 = vsel %vm415_vm9, %v500_v62, %v414_v14 }
 0x246   :  { %v266_v53 = vmul.f32 %v456_v49, %v265_v52 }
 0x248   :  { %v269_v31 = vsel %vm268_vm10, %v266_v53, 0.0 }
 0x249   :  { %270 = vadd.xlane.f32.xlu2 %v269_v31 }
 0x251   :  { %401 = vadd.xlane.f32.xlu2 %v400_v60 }
 0x2bc   :  { %v271_v63 = vpop.xlane.xlu2 %270 }
 0x2bd   :  { %v272_v0 = vrot.slane %v271_v63, 4 }
 0x2bf   :  { %v273_v1 = vadd.f32 %v272_v0, %v271_v63 }
 0x2c1   :  { %v274_v3 = vrot.slane %v273_v1, 2 }
 0x2c3   :  { %v275_v4 = vadd.f32 %v274_v3, %v273_v1 }
 0x2c4   :  { %v402_v6 = vpop.xlane.xlu2 %401 }
 0x2c5   :  { %v403_v7 = vrot.slane %v402_v6, 4  ;;  %v276_v8 = vrot.slane %v275_v4, 1 }
 0x2c7   :  { %v404_v9 = vadd.f32 %v403_v7, %v402_v6  ;;  %v277_v10 = vadd.f32 %v276_v8, %v275_v4 }
 0x2c9   :  { %v405_v12 = vrot.slane %v404_v9, 2  ;;  %459 = vpush %v277_v10 }
 0x2cb   :  { %v406_v13 = vadd.f32 %v405_v12, %v404_v9 }
 0x2cd   :  { %v407_v15 = vrot.slane %v406_v13, 1 }
 0x2cf   :  { %v408_v16 = vadd.f32 %v407_v15, %v406_v13 }
 0x2d1   :  { %461 = vpush %v408_v16 }
 0x2d2   :  { %463 = vpush %v416_v17 }
 0x2d3   :  { %465 = vpush %v622_v35 }
 0x2fa   :  { %s460_s0 = spop %459 }
 0x302   :  { %s462_s1 = spop %461 }
 0x303   :  { %s464_s19 = spop %463 }
 0x304   :  { %s418_s20 = smul.f32 %s464_s19, %s462_s1  ;;  %s466_s21 = spop %465 }
 0x305   :  { %s428_s22 = smul.f32 %s466_s21, %s460_s0 }
 0x306   :  { %s430_s26 = ssub.f32 1.0, %s418_s20 }
 0x307   :  { %s429_s27 = ssub.f32 1.0, %s428_s22 }
 0x309   :  { %s431_s28 = sadd.f32 %s430_s26, %s429_s27 }
 0x30b   :  { %433 = sst [smem:[#allocation9]] %s431_s28 }
 0x30c   :  { %442 = dma.smem_to_hbm %s574_s29, 16, %s440_s25, [#allocation6]  }
 0x30d   :  { %565 = dma.done.wait [#allocation6], 16  }
 0x30e   :  { %566 = vsyncadd [#allocation6], 4294967280 }
 0x30f   :  { %447 = sfence }
 0x310   :  { %448 = vsyncpa [#allocation5], 1 }
 0x311   :  { %449 = vsyncpa [#allocation8], 1 }
 0x312   :  { %450 = vsyncpa [#allocation6], 1 }

</bundles_post_ra>
